<compile_context>
chip_gen: v6e
topology: v6e:2x2x1
jax: 0.10.0
libtpu: 0.0.40
codegen_flags: <defaults>
</compile_context>

<pallas_src>
import functools

import jax
import jax.numpy as jnp
from jax import lax
from jax.experimental import pallas as pl
from jax.experimental.pallas import tpu as pltpu


def _default_vmem_limit():
    try:
        cap = int(pltpu.get_tpu_info().vmem_capacity_bytes)
    except Exception:
        cap = 128 * 1024 * 1024
    # ~60% of physical VMEM, clamped: 76 MiB on 128 MiB chips, 38 MiB on v7x.
    return max(32 * 1024 * 1024, min(96 * 1024 * 1024, int(cap * 0.6)))


VMEM_LIMIT = _default_vmem_limit()


def _tile(dim, target, align):
    """Largest `align`-multiple divisor of dim that is <= target, else full dim."""
    if dim <= target:
        return dim
    t = (target // align) * align
    while t >= align:
        if dim % t == 0:
            return t
        t -= align
    return dim


def _chunk_len(L, target=256):
    """Chunk length: multiple of 128 dividing L (<= target), else the full L."""
    t = min((max(target, 128) // 128) * 128, (L // 128) * 128)
    while t >= 128:
        if L % t == 0:
            return t
        t -= 128
    return L


# ----------------------------------------------------------------------------
# Tiled linear (optionally fused Hardswish epilogue)
# ----------------------------------------------------------------------------
def _linear_kernel(x_ref, w_ref, b_ref, o_ref, acc_ref, *, act):
    k = pl.program_id(2)

    @pl.when(k == 0)
    def _():
        acc_ref[...] = jnp.zeros_like(acc_ref)

    acc_ref[...] += jnp.dot(x_ref[...], w_ref[...],
                            preferred_element_type=jnp.float32)

    @pl.when(k == pl.num_programs(2) - 1)
    def _():
        y = acc_ref[...] + b_ref[...]
        if act == "hardswish":
            y = y * jnp.clip(y + 3.0, 0.0, 6.0) * (1.0 / 6.0)
        o_ref[...] = y.astype(o_ref.dtype)


def pallas_linear(x, w, b, act=None, out_dtype=jnp.float32,
                  tm=512, tn=512, tk=1024):
    """y = act(x @ w + b).  Matmul operands in bf16, accumulation in f32."""
    M, K = x.shape
    N = w.shape[1]
    tm = _tile(M, tm, 8)
    tn = _tile(N, tn, 128)
    tk = _tile(K, tk, 128)
    xb = x.astype(jnp.bfloat16)
    wb = w.astype(jnp.bfloat16)
    return pl.pallas_call(
        functools.partial(_linear_kernel, act=act),
        out_shape=jax.ShapeDtypeStruct((M, N), out_dtype),
        grid=(M // tm, N // tn, K // tk),
        in_specs=[
            pl.BlockSpec((tm, tk), lambda i, j, k: (i, k)),
            pl.BlockSpec((tk, tn), lambda i, j, k: (k, j)),
            pl.BlockSpec((1, tn), lambda i, j, k: (0, j)),
        ],
        out_specs=pl.BlockSpec((tm, tn), lambda i, j, k: (i, j)),
        scratch_shapes=[pltpu.VMEM((tm, tn), jnp.float32)],
        compiler_params=pltpu.CompilerParams(
            dimension_semantics=("parallel", "parallel", "arbitrary"),
            vmem_limit_bytes=VMEM_LIMIT),
    )(xb, wb, b.reshape(1, N))


# ----------------------------------------------------------------------------
# Tiled linear with fused (+residual) + LayerNorm epilogue (N kept whole).
# Accumulates directly into the resident f32 output block (no acc scratch).
# ----------------------------------------------------------------------------
def _linear_res_ln_kernel(x_ref, w_ref, b_ref, *rest, eps, has_res):
    if has_res:
        res_ref, lnw_ref, lnb_ref, o_ref = rest
    else:
        lnw_ref, lnb_ref, o_ref = rest
    k = pl.program_id(1)

    @pl.when(k == 0)
    def _():
        o_ref[...] = jnp.zeros_like(o_ref)

    o_ref[...] += jnp.dot(x_ref[...], w_ref[...],
                          preferred_element_type=jnp.float32)

    @pl.when(k == pl.num_programs(1) - 1)
    def _():
        h = o_ref[...] + b_ref[...]
        if has_res:
            h = h + res_ref[...].astype(jnp.float32)
        mu = jnp.mean(h, axis=-1, keepdims=True)
        hc = h - mu
        var = jnp.mean(hc * hc, axis=-1, keepdims=True)
        o_ref[...] = (hc * lax.rsqrt(var + eps) * lnw_ref[...]
                      + lnb_ref[...]).astype(o_ref.dtype)


def pallas_linear_res_ln(x, w, b, res, ln_w, ln_b, eps, tm=256, tk=1024):
    """out = LayerNorm(x @ w + b [+ res]).  Norm math in f32, matmul in bf16."""
    M, K = x.shape
    N = w.shape[1]
    tm = _tile(M, tm, 8)
    tk = _tile(K, tk, 128)
    has_res = res is not None
    xb = x.astype(jnp.bfloat16)
    wb = w.astype(jnp.bfloat16)

    args = [xb, wb, b.reshape(1, N)]
    in_specs = [
        pl.BlockSpec((tm, tk), lambda i, k: (i, k)),
        pl.BlockSpec((tk, N), lambda i, k: (k, 0)),
        pl.BlockSpec((1, N), lambda i, k: (0, 0)),
    ]
    if has_res:
        args.append(res)
        in_specs.append(pl.BlockSpec((tm, N), lambda i, k: (i, 0)))
    args += [ln_w.reshape(1, N), ln_b.reshape(1, N)]
    in_specs += [
        pl.BlockSpec((1, N), lambda i, k: (0, 0)),
        pl.BlockSpec((1, N), lambda i, k: (0, 0)),
    ]
    return pl.pallas_call(
        functools.partial(_linear_res_ln_kernel, eps=eps, has_res=has_res),
        out_shape=jax.ShapeDtypeStruct((M, N), jnp.float32),
        grid=(M // tm, K // tk),
        in_specs=in_specs,
        out_specs=pl.BlockSpec((tm, N), lambda i, k: (i, 0)),
        compiler_params=pltpu.CompilerParams(
            dimension_semantics=("parallel", "arbitrary"),
            vmem_limit_bytes=VMEM_LIMIT),
    )(*args)


# ----------------------------------------------------------------------------
# Fused chunked SSD kernel:
#   split z / xBC / dt  ->  causal depthwise conv + SiLU (tail carried in VMEM)
#   ->  chunked SSD scan (bf16 MXU, batched head dot, flat (N, d_inner) state)
#   ->  gated RMSNorm epilogue
# ----------------------------------------------------------------------------
def _ssd_fused_kernel(full_ref, convw_ref, convb_ref, A_ref, dtb_ref, Dv_ref,
                      rmsw_ref, o_ref, S_ref, tail_ref, *,
                      H, P, N, d_inner, conv_dim, kconv, eps):
    c = pl.program_id(1)
    Lc = o_ref.shape[1]
    KH = kconv - 1

    @pl.when(c == 0)
    def _():
        S_ref[...] = jnp.zeros_like(S_ref)
        tail_ref[...] = jnp.zeros_like(tail_ref)

    full = full_ref[0]                                           # (Lc, d_in_proj) bf16
    z = full[:, :d_inner].astype(jnp.float32)                    # (Lc, d_inner)
    xBC = full[:, d_inner:d_inner + conv_dim].astype(jnp.float32)
    dt_raw = full[:, d_inner + conv_dim:].astype(jnp.float32)    # (Lc, H)

    # ---- causal depthwise conv (tail from previous chunk) + SiLU ----
    if KH > 0:
        padded = jnp.concatenate([tail_ref[...], xBC], axis=0)   # (Lc+KH, conv_dim)
    else:
        padded = xBC
    acc = jnp.zeros((Lc, conv_dim), jnp.float32) + convb_ref[...]
    for k in range(kconv):                                       # static, d_conv taps
        acc = acc + padded[k:k + Lc, :] * convw_ref[k:k + 1, :]
    if KH > 0 and Lc >= KH:                                      # carry raw tail
        tail_ref[...] = xBC[Lc - KH:, :]
    xBC_c = acc * (1.0 / (1.0 + jnp.exp(-acc)))                  # SiLU, f32
    xc = xBC_c[:, :d_inner]                                      # (Lc, d_inner)
    Bm = xBC_c[:, d_inner:d_inner + N].astype(jnp.bfloat16)      # (Lc, N)
    Cm = xBC_c[:, d_inner + N:].astype(jnp.bfloat16)             # (Lc, N)

    # ---- dt / per-head decay statistics ----
    v = dt_raw + dtb_ref[...]
    dt = jnp.maximum(v, 0.0) + jnp.log1p(jnp.exp(-jnp.abs(v)))   # softplus (Lc, H)
    dtA = dt * (-jnp.exp(A_ref[...]))                            # (Lc, H)

    t_idx = lax.broadcasted_iota(jnp.int32, (Lc, Lc), 0)
    s_idx = lax.broadcasted_iota(jnp.int32, (Lc, Lc), 1)
    causal = t_idx >= s_idx
    G = jnp.dot(causal.astype(jnp.float32), dtA,
                preferred_element_type=jnp.float32)              # inclusive cumsum (Lc, H)
    expG = jnp.exp(G)                                            # (Lc, H), <= 1
    G_last = G[Lc - 1:Lc, :]                                     # (1, H)
    exp_G_last = jnp.exp(G_last)                                 # (1, H)
    wdec = jnp.exp(G_last - G) * dt                              # (Lc, H), stable

    def expand(a):                                               # (R, H) -> (R, H*P)
        r = a.shape[0]
        return jnp.broadcast_to(a[:, :, None], (r, H, P)).reshape(r, H * P)

    # ---- intra-chunk: per-head masked decay, one batched MXU dot ----
    Gh = G.T                                                     # (H, Lc)
    diff = Gh[:, :, None] - Gh[:, None, :]                       # (H, Lc, Lc)
    decay = jnp.exp(jnp.where(causal[None, :, :], diff, -jnp.inf))
    CB = lax.dot_general(Cm, Bm, (((1,), (1,)), ((), ())),
                         preferred_element_type=jnp.float32)     # C @ B^T  (Lc, Lc)
    Mt = (decay * CB[None, :, :]).astype(jnp.bfloat16)           # (H, Lc, Lc)

    xh = xc.reshape(Lc, H, P).transpose(1, 0, 2)                 # (H, Lc, P)
    xdt = (xh * dt.T[:, :, None]).astype(jnp.bfloat16)           # (H, Lc, P)
    y_i = lax.dot_general(Mt, xdt, (((2,), (1,)), ((0,), (0,))),
                          preferred_element_type=jnp.float32)    # (H, Lc, P)
    y = y_i.transpose(1, 0, 2).reshape(Lc, d_inner)              # (Lc, d_inner)

    # ---- inter-chunk contribution from carried state (flat, lane-dense) ----
    y = y + expand(expG) * jnp.dot(Cm, S_ref[...].astype(jnp.bfloat16),
                                   preferred_element_type=jnp.float32)
    y = y + Dv_ref[...] * xc

    # ---- state update: S' = diag(exp(G_last)) S + B^T @ (wdec * x) ----
    xw = (xc * expand(wdec)).astype(jnp.bfloat16)                # (Lc, d_inner)
    dS = lax.dot_general(Bm, xw, (((0,), (0,)), ((), ())),
                         preferred_element_type=jnp.float32)     # (N, d_inner)
    S_ref[...] = expand(exp_G_last) * S_ref[...] + dS

    # ---- fused gated RMSNorm:  rmsnorm(y * silu(z)) * rms_w  ----
    g = y * (z * (1.0 / (1.0 + jnp.exp(-z))))
    var = jnp.mean(g * g, axis=-1, keepdims=True)
    o_ref[0] = (g * lax.rsqrt(var + eps) * rmsw_ref[...]).astype(o_ref.dtype)


def pallas_ssd_fused(full, conv_w, conv_b, A_log, D, dt_bias, rms_w, *,
                     d_inner, d_state, d_conv, head_dim, eps, chunk_target=256):
    """full: (B, L, d_in_proj) bf16 -> (B, L, d_inner) bf16."""
    Bsz, L, d_in_proj = full.shape
    H = A_log.shape[0]
    P = head_dim
    N = d_state
    conv_dim = d_inner + 2 * d_state
    Lc = _chunk_len(L, chunk_target)
    nchunks = L // Lc
    KH = max(d_conv - 1, 1)

    Dv = jnp.repeat(D, P).reshape(1, d_inner)

    return pl.pallas_call(
        functools.partial(_ssd_fused_kernel, H=H, P=P, N=N, d_inner=d_inner,
                          conv_dim=conv_dim, kconv=d_conv, eps=eps),
        out_shape=jax.ShapeDtypeStruct((Bsz, L, d_inner), jnp.bfloat16),
        grid=(Bsz, nchunks),
        in_specs=[
            pl.BlockSpec((1, Lc, d_in_proj), lambda b, c: (b, c, 0)),   # in_proj chunk
            pl.BlockSpec((d_conv, conv_dim), lambda b, c: (0, 0)),      # conv weight
            pl.BlockSpec((1, conv_dim), lambda b, c: (0, 0)),           # conv bias
            pl.BlockSpec((1, H), lambda b, c: (0, 0)),                  # A_log
            pl.BlockSpec((1, H), lambda b, c: (0, 0)),                  # dt_bias
            pl.BlockSpec((1, d_inner), lambda b, c: (0, 0)),            # D (per channel)
            pl.BlockSpec((1, d_inner), lambda b, c: (0, 0)),            # rms weight
        ],
        out_specs=pl.BlockSpec((1, Lc, d_inner), lambda b, c: (b, c, 0)),
        scratch_shapes=[pltpu.VMEM((N, d_inner), jnp.float32),          # SSM state
                        pltpu.VMEM((KH, conv_dim), jnp.float32)],       # conv tail
        compiler_params=pltpu.CompilerParams(
            dimension_semantics=("parallel", "arbitrary"),
            vmem_limit_bytes=VMEM_LIMIT),
    )(full, conv_w, conv_b.reshape(1, conv_dim), A_log.reshape(1, H),
      dt_bias.reshape(1, H), Dv, rms_w.reshape(1, d_inner))


# ----------------------------------------------------------------------------
# Parameter init (deterministic, synthetic) and forward glue
# ----------------------------------------------------------------------------
def init_ssd_layer_params(key, d_model, d_state, d_conv, expand, head_dim):
    d_inner = expand * d_model
    nheads = d_inner // head_dim
    conv_dim = d_inner + 2 * d_state
    d_in_proj = 2 * d_inner + 2 * d_state + nheads
    ks = jax.random.split(key, 12)
    s = 0.02
    return dict(
        in_proj_w=jax.random.normal(ks[0], (d_model, d_in_proj), jnp.float32) * s,
        in_proj_b=jax.random.normal(ks[1], (d_in_proj,), jnp.float32) * s,
        conv_w=jax.random.normal(ks[2], (d_conv, conv_dim), jnp.float32) * s,
        conv_b=jax.random.normal(ks[3], (conv_dim,), jnp.float32) * s,
        dt_bias=jax.random.normal(ks[4], (nheads,), jnp.float32) * 0.1,
        A_log=jnp.log(jnp.linspace(1.0, 4.0, nheads)).astype(jnp.float32),
        D=jnp.ones((nheads,), jnp.float32),
        rms_w=jnp.ones((d_inner,), jnp.float32),
        out_proj_w=jax.random.normal(ks[5], (d_inner, d_model), jnp.float32) * s,
        out_proj_b=jax.random.normal(ks[6], (d_model,), jnp.float32) * s,
        ln_w=jnp.ones((d_model,), jnp.float32),
        ln_b=jnp.zeros((d_model,), jnp.float32),
        fc1_w=jax.random.normal(ks[7], (d_model, 4 * d_model), jnp.float32) * s,
        fc1_b=jax.random.normal(ks[8], (4 * d_model,), jnp.float32) * s,
        fc2_w=jax.random.normal(ks[9], (4 * d_model, d_model), jnp.float32) * s,
        fc2_b=jax.random.normal(ks[10], (d_model,), jnp.float32) * s,
        ffn_ln_w=jnp.ones((d_model,), jnp.float32),
        ffn_ln_b=jnp.zeros((d_model,), jnp.float32),
    )


def ssd_layer_forward(x, p, *, d_state, d_conv, expand, head_dim, chunk_size,
                      num_layers, is_ffn=True, norm_eps=1e-12):
    # x: (B, L, d_model) float32   (dropout is identity in eval mode)
    B, L, D = x.shape
    d_inner = expand * D
    conv_dim = d_inner + 2 * d_state
    nheads = d_inner // head_dim
    d_in_proj = 2 * d_inner + 2 * d_state + nheads

    x2 = x.reshape(B * L, D)

    # --- single lane-dense in_proj (z | xBC | dt packed), bf16 output ---
    full = pallas_linear(x2, p["in_proj_w"], p["in_proj_b"],
                         out_dtype=jnp.bfloat16)                  # (B*L, d_in_proj)

    # --- fused: split + causal conv + SiLU + chunked SSD scan + gated RMSNorm ---
    chunk_target = min(max(chunk_size, 256), 512)
    yn = pallas_ssd_fused(full.reshape(B, L, d_in_proj),
                          p["conv_w"], p["conv_b"], p["A_log"], p["D"],
                          p["dt_bias"], p["rms_w"],
                          d_inner=d_inner, d_state=d_state, d_conv=d_conv,
                          head_dim=head_dim, eps=norm_eps,
                          chunk_target=chunk_target)              # (B, L, d_inner) bf16

    # --- out_proj fused with (+residual) + LayerNorm ---
    res = x2 if num_layers != 1 else None
    h = pallas_linear_res_ln(yn.reshape(B * L, d_inner),
                             p["out_proj_w"], p["out_proj_b"],
                             res, p["ln_w"], p["ln_b"], norm_eps)  # (B*L, D) f32

    # --- FFN: fc1 -> Hardswish (fused) -> fc2 (+res, +LayerNorm fused) ---
    if is_ffn:
        h1 = pallas_linear(h, p["fc1_w"], p["fc1_b"],
                           act="hardswish", out_dtype=jnp.bfloat16)
        out = pallas_linear_res_ln(h1, p["fc2_w"], p["fc2_b"], h,
                                   p["ffn_ln_w"], p["ffn_ln_b"], norm_eps)
    else:
        out = h
    # TODO(synk): on v7x with batch==1 the SSD scan's only parallel grid axis has
    # extent 1, so one TensorCore idles; a head-group split would need the gated
    # RMSNorm moved into the out_proj epilogue.
    return out.reshape(B, L, D)


if __name__ == "__main__":
    key = jax.random.PRNGKey(0)
    kx, kp = jax.random.split(key)

    # small shapes consistent with the module
    batch, seq_len, d_model = 2, 8, 32
    d_state, d_conv, expand, head_dim = 8, 4, 2, 16
    chunk_size, num_layers = 4, 2  # chunking only changes scheduling, not results

    x = jax.random.normal(kx, (batch, seq_len, d_model), jnp.float32)
    params = init_ssd_layer_params(kp, d_model, d_state, d_conv, expand, head_dim)

    out = ssd_layer_forward(
        x, params, d_state=d_state, d_conv=d_conv, expand=expand,
        head_dim=head_dim, chunk_size=chunk_size, num_layers=num_layers,
        is_ffn=True, norm_eps=1e-12)
    out = jax.block_until_ready(out)

    assert out.shape == (batch, seq_len, d_model)
    assert bool(jnp.all(jnp.isfinite(out)))
    print("KERNEL_OK")
</pallas_src>

<mosaic_0001>
module attributes {stable_mosaic.version = 11 : i64} {
  func.func @_linear_kernel(%arg0: i32, %arg1: i32, %arg2: i32, %arg3: memref<16x32xbf16, #tpu.memory_space<vmem>>, %arg4: memref<32x148xbf16, #tpu.memory_space<vmem>>, %arg5: memref<1x148xf32, #tpu.memory_space<vmem>>, %arg6: memref<16x148xbf16, #tpu.memory_space<vmem>>, %arg7: memref<16x148xf32, #tpu.memory_space<vmem>>) attributes {dimension_semantics = [#tpu.dimension_semantics<parallel>, #tpu.dimension_semantics<parallel>, #tpu.dimension_semantics<arbitrary>], iteration_bounds = array<i64: 1, 1, 1>, scalar_prefetch = 0 : i64, scratch_operands = 1 : i64, tpu.core_type = #tpu.core_type<tc>, window_params = [{transform_indices = @transform_0, window_bounds = array<i64: 16, 32>}, {transform_indices = @transform_1, window_bounds = array<i64: 32, 148>}, {transform_indices = @transform_2, window_bounds = array<i64: 1, 148>}, {transform_indices = @transform_3, window_bounds = array<i64: 16, 148>}]} {
    %c0_i32 = arith.constant 0 : i32
    %0 = arith.cmpi eq, %arg2, %c0_i32 : i32
    %1 = arith.extui %0 : i1 to i32
    %c0_i32_0 = arith.constant 0 : i32
    %2 = arith.cmpi ne, %1, %c0_i32_0 : i32
    scf.if %2 {
      %cst_10 = arith.constant 0.000000e+00 : f32
      %12 = vector.broadcast %cst_10 : f32 to vector<16x148xf32>
      %c0_11 = arith.constant 0 : index
      %c0_12 = arith.constant 0 : index
      %13 = vector.load %arg7[%c0_11, %c0_12] : memref<16x148xf32, #tpu.memory_space<vmem>>, vector<16x148xf32>
      tpu.vector_store %arg7[%c0_11, %c0_12], %12 {strides = array<i32>} : memref<16x148xf32, #tpu.memory_space<vmem>>, vector<16x148xf32>,
    } else {
    }
    %c0 = arith.constant 0 : index
    %c0_1 = arith.constant 0 : index
    %3 = vector.load %arg7[%c0, %c0_1] : memref<16x148xf32, #tpu.memory_space<vmem>>, vector<16x148xf32>
    %c0_2 = arith.constant 0 : index
    %c0_3 = arith.constant 0 : index
    %4 = vector.load %arg3[%c0_2, %c0_3] : memref<16x32xbf16, #tpu.memory_space<vmem>>, vector<16x32xbf16>
    %c0_4 = arith.constant 0 : index
    %c0_5 = arith.constant 0 : index
    %5 = vector.load %arg4[%c0_4, %c0_5] : memref<32x148xbf16, #tpu.memory_space<vmem>>, vector<32x148xbf16>
    %cst = arith.constant dense<0.000000e+00> : vector<16x148xf32>
    %6 = tpu.matmul %4, %5, %cst {dimension_numbers = #tpu.dot_dimension_numbers<[1], [0], [0], [1], [0, 0, 1, 1], [], []>} : vector<16x32xbf16>, vector<32x148xbf16>, vector<16x148xf32> -> vector<16x148xf32>
    %7 = arith.addf %3, %6 : vector<16x148xf32>
    %c0_6 = arith.constant 0 : index
    %c0_7 = arith.constant 0 : index
    %8 = vector.load %arg7[%c0_6, %c0_7] : memref<16x148xf32, #tpu.memory_space<vmem>>, vector<16x148xf32>
    tpu.vector_store %arg7[%c0_6, %c0_7], %7 {strides = array<i32>} : memref<16x148xf32, #tpu.memory_space<vmem>>, vector<16x148xf32>,
    %c0_i32_8 = arith.constant 0 : i32
    %9 = arith.cmpi eq, %arg2, %c0_i32_8 : i32
    %10 = arith.extui %9 : i1 to i32
    %c0_i32_9 = arith.constant 0 : i32
    %11 = arith.cmpi ne, %10, %c0_i32_9 : i32
    scf.if %11 {
      %c0_10 = arith.constant 0 : index
      %c0_11 = arith.constant 0 : index
      %12 = vector.load %arg7[%c0_10, %c0_11] : memref<16x148xf32, #tpu.memory_space<vmem>>, vector<16x148xf32>
      %c0_12 = arith.constant 0 : index
      %c0_13 = arith.constant 0 : index
      %13 = vector.load %arg5[%c0_12, %c0_13] : memref<1x148xf32, #tpu.memory_space<vmem>>, vector<1x148xf32>
      %14 = vector.broadcast %13 : vector<1x148xf32> to vector<16x148xf32>
      %15 = arith.addf %12, %14 : vector<16x148xf32>
      %16 = arith.truncf %15 : vector<16x148xf32> to vector<16x148xbf16>
      %c0_14 = arith.constant 0 : index
      %c0_15 = arith.constant 0 : index
      %17 = vector.load %arg6[%c0_14, %c0_15] : memref<16x148xbf16, #tpu.memory_space<vmem>>, vector<16x148xbf16>
      tpu.vector_store %arg6[%c0_14, %c0_15], %16 {strides = array<i32>} : memref<16x148xbf16, #tpu.memory_space<vmem>>, vector<16x148xbf16>,
    } else {
    }
    return
  }
  func.func @transform_0(%arg0: i32, %arg1: i32, %arg2: i32) -> (i32, i32) {
    %c0_i32 = arith.constant 0 : i32
    return %arg0, %arg2 : i32, i32
  }
  func.func @transform_1(%arg0: i32, %arg1: i32, %arg2: i32) -> (i32, i32) {
    %c0_i32 = arith.constant 0 : i32
    return %arg2, %arg1 : i32, i32
  }
  func.func @transform_2(%arg0: i32, %arg1: i32, %arg2: i32) -> (i32, i32) {
    %c0_i32 = arith.constant 0 : i32
    %c0_i32_0 = arith.constant 0 : i32
    return %c0_i32, %arg1 : i32, i32
  }
  func.func @transform_3(%arg0: i32, %arg1: i32, %arg2: i32) -> (i32, i32) {
    %c0_i32 = arith.constant 0 : i32
    return %arg0, %arg1 : i32, i32
  }
}

</mosaic_0001>

<bundles_post_ra>
// kernel: tpu_custom_call.1
= control target key start
LH: loop header
LB: loop body
LE: loop exit
PB: predicated region body
PF: predicated region fallthrough
CT: control target
= control target key end

     0   :  { %8 = vsyncpa [#allocation4], 0  ;;  %s345_s0 = inlined_call_operand.hbm [shape: bf16[16,32], index: 0, kind: input, shape index: {}]   ;;  %s346_s1 = inlined_call_operand.hbm [shape: bf16[32,148], index: 1, kind: input, shape index: {}]   ;;  %s347_s2 = inlined_call_operand.vmem [shape: f32[1,148], index: 2, kind: input, shape index: {}]   ;;  %s348_s3 = inlined_call_operand.hbm [shape: bf16[16,148], index: 3, kind: output, shape index: {}]  }
   0x1   :  { %9 = vsyncpa [#allocation7], 0 }
   0x2   :  { %10 = vsyncpa [#allocation5], 0  ;;  %s294_s12 = smov [#allocation3]  }
   0x3   :  { %s16_s13 = sshll.u32 %s294_s12, 4  ;;  %s17_s13 = int_to_ptr.vmem [resolvable:$true] %s16_s13 }
   0x4   :  { %s236_s14 = scalar_lea.vmem %s17_s13, 128  ;;  %p241_p1 = scmp.lt.s32.totalorder %s17_s13, %s17_s13 }
   0x5   :  { %p237_p0 = scmp.ne.s32.totalorder %s17_s13, %s236_s14  ;;  %p242_p2 = scmp.lt.s32.totalorder %s236_s14, %s236_s14 }
   0x7   :  { %p243_p3 = por %p242_p2, %p241_p1 }
   0x9   :  { %p244_p4 = pnand %p243_p3, %p237_p0 }
   0xb   :  { %247 = shalt.err (!%p244_p4)
}
   0xc   :  { %s295_s15 = smov 64   ;;  %s296_s16 = smov 4  }
   0xd   :  { %22 = dma.hbm_to_vmem [thread:$0]  %s345_s0, 128, %s17_s13, [#allocation4], %s295_s15, %s295_s15, %s296_s16  }
   0xe   :  { %s297_s19 = smov [#allocation6]  }
   0xf   :  { %s28_s20 = sshll.u32 %s297_s19, 4  ;;  %s29_s20 = int_to_ptr.vmem [resolvable:$true] %s28_s20 }
  0x10   :  { %s256_s21 = scalar_lea.vmem %s29_s20, 512  ;;  %p261_p6 = scmp.lt.s32.totalorder %s29_s20, %s29_s20 }
  0x11   :  { %p257_p5 = scmp.ne.s32.totalorder %s29_s20, %s256_s21  ;;  %p262_p7 = scmp.lt.s32.totalorder %s256_s21, %s256_s21 }
  0x13   :  { %p263_p8 = por %p262_p7, %p261_p6 }
  0x15   :  { %p264_p9 = pnand %p263_p8, %p257_p5 }
  0x17   :  { %267 = shalt.err (!%p264_p9)
}
  0x18   :  { %s298_s22 = smov 128   ;;  %s299_s23 = smov 8  }
  0x19   :  { %34 = dma.hbm_to_vmem [thread:$0]  %s346_s1, 512, %s29_s20, [#allocation7], %s298_s22, %s298_s22, %s299_s23  }
  0x1a   :  { %288 = dma.done.wait [#allocation4], 128  }
  0x1b   :  { %289 = vsyncadd [#allocation4], 4294967168 }
  0x1c   :  { %290 = dma.done.wait [#allocation7], 512  }
  0x1d   :  { %291 = vsyncadd [#allocation7], 4294966784  ;;  %v300_v0 = vmov 0   ;;  %v221_v1 = vld [vmem:[#allocation6 + $0x14] ss:$8 sps:$4 sm:$0xff]   ;;  %vm88_vm0 = vcmask 261120   ;;  %v153_v7 = vlaneseq }
  0x1e   :  { %124 = vmatprep.mubr.bf16.mxu0 %v300_v0  ;;  %v223_v2 = vld [vmem:[#allocation6 + $0x10] ss:$8 sps:$4 sm:$0xff]   ;;  %104 = vmatprep.subr.bf16.mxu0 %v221_v1  ;;  %v224_v3 = vld [vmem:[#allocation6 + $0x4] ss:$8 sps:$4 sm:$0xff]   ;;  %v226_v4 = vld [vmem:[#allocation6] ss:$8 sps:$4 sm:$0xff]  }
  0x1f   :  { %105 = vmatpush1.bf16.msra.mxu0 %v223_v2  ;;  %v227_v5 = vld [vmem:[#allocation3] sm:$0xff]   ;;  %vm49_vm1 = vcmask 162816   ;;  %v301_v6 = vmov 0.0   ;;  %v154_v10 = vshrl.u32 %v153_v7, 7  ;;  %vm179_vm2 = vcmask 1043456   ;;  %s302_s26 = smov [#allocation8]  }
  0x20   :  { %106 = vmatprep.subr.bf16.mxu0 %v224_v3  ;;  %50 = vst.msk [vmem:[#allocation2 + $0x8] sm:$0xff] %vm49_vm1, %v301_v6  ;;  %52 = vst.msk [vmem:[#allocation2 + $0x18] sm:$0xff] %vm49_vm1, %v301_v6  ;;  %v151_v18 = vld [vmem:[%s347_s2] sm:$0x3]  ;;  %vm180_vm3 = vcmask 162820   ;;  %s189_s27 = sshll.u32 %s302_s26, 4  ;;  %s190_s27 = int_to_ptr.vmem [resolvable:$true] %s189_s27 }
  0x21   :  { %v155_v15 = vsub.s32 0, %v154_v10  ;;  %v159_v16 = vsub.s32 1, %v154_v10  ;;  %vm181_vm4 = vmor %vm180_vm3, %vm179_vm2  ;;  %s268_s2 = scalar_lea.vmem %s190_s27, 256  ;;  %p273_p11 = scmp.lt.s32.totalorder %s190_s27, %s190_s27 }
  0x22   :  { %p269_p10 = scmp.ne.s32.totalorder %s190_s27, %s268_s2  ;;  %p274_p12 = scmp.lt.s32.totalorder %s268_s2, %s268_s2 }
  0x23   :  { %107 = vmatpush1.bf16.msra.mxu0 %v226_v4  ;;  %v156_v20 = vrot.slane %v151_v18, %v155_v15  ;;  %v160_v21 = vrot.slane %v151_v18, %v159_v16 }
  0x24   :  { %p275_p13 = por %p274_p12, %p273_p11 }
  0x26   :  { %207 = vmatmul.mubr.msk.bf16.vlgmr.msra.gmra.mxu0 %vm88_vm0, %v227_v5  ;;  %p276_p0 = pnand %p275_p13, %p269_p10 }
  0x27   :  { %v54_v9 = vld [vmem:[#allocation2 + $0x8] sm:$0xff]  ;;  %v56_v14 = vld [vmem:[#allocation2 + $0x18] sm:$0xff] }
  0xe6   :  { %v126_v8 = vpop.f32.mrf.mxu0 }
  0xe7   :  { %v163_v23 = vadd.f32 %v156_v20, %v126_v8 }
  0xe8   :  { %v128_v11 = vpop.f32.mrf.mxu0 }
  0xe9   :  { %v136_v12 = vadd.f32 %v128_v11, %v54_v9 }
  0xea   :  { %v130_v13 = vpop.f32.mrf.mxu0 }
  0xeb   :  { %141 = vst.msk [vmem:[#allocation2 + $0x8] sm:$0xff] %vm49_vm1, %v136_v12  ;;  %v165_v27 = vadd.f32 %v156_v20, %v130_v13 }
  0xec   :  { %v132_v17 = vpop.f32.mrf.mxu0 }
  0xed   :  { %v138_v19 = vadd.f32 %v132_v17, %v56_v14 }
  0xef   :  { %143 = vst.msk [vmem:[#allocation2 + $0x18] sm:$0xff] %vm49_vm1, %v138_v19 }
  0xf2   :  { %v148_v22 = vld [vmem:[#allocation2 + $0x8] sm:$0xff] }
  0xf3   :  { %v164_v24 = vadd.f32 %v160_v21, %v148_v22 }
  0xf5   :  { %v210_v25 = vpack.c.bf16 %v164_v24, %v163_v23 }
  0xf6   :  { %v150_v26 = vld [vmem:[#allocation2 + $0x18] sm:$0xff] }
  0xf7   :  { %v166_v28 = vadd.f32 %v160_v21, %v150_v26  ;;  %182 = vst.msk [vmem:[#allocation8] sm:$0xff] %vm181_vm4, %v210_v25 }
  0xf9   :  { %v211_v29 = vpack.c.bf16 %v166_v28, %v165_v27 }
  0xfb   :  { %183 = vst.msk [vmem:[#allocation8 + $0x8] sm:$0xff] %vm181_vm4, %v211_v29 }
  0xfc   :  { %279 = shalt.err (!%p276_p0)
}
  0xfd   :  { %195 = dma.vmem_to_hbm [thread:$0]  %s190_s27, 256, %s348_s3, [#allocation5], %s298_s22, %s298_s22, %s299_s23  }
  0xfe   :  { %292 = dma.done.wait [#allocation5], 256  }
  0xff   :  { %293 = vsyncadd [#allocation5], 4294967040 }
 0x100   :  { %199 = vsyncpa [#allocation4], 1 }
 0x101   :  { %200 = vsyncpa [#allocation7], 1 }
 0x102   :  { %201 = vsyncpa [#allocation5], 1 }

</bundles_post_ra>
